<compile_context>
chip_gen: v7x
topology: tpu7x:2x2x1
jax: 0.10.0
libtpu: 0.0.40
codegen_flags: <defaults>
</compile_context>

<pallas_src>
import jax
import jax.numpy as jnp
from jax.experimental import pallas as pl
from jax.experimental.pallas import tpu as pltpu


def _dwt_kernel(x_ref, rs_ref, rd_ref, cl_ref, ch_ref, ll_ref, hi_ref):
    """One (H, W) image plane -> four (H/2, W/2) Haar subbands."""
    f32 = jnp.float32
    prec = jax.lax.Precision.HIGHEST

    x = x_ref[0, 0].astype(f32)                                     # (H, W)

    # Row analysis:  S[i, :] = (x[2i, :] + x[2i+1, :]) / 2
    #                D[i, :] = (x[2i+1, :] - x[2i, :]) / 2
    s = jnp.dot(rs_ref[...], x, precision=prec, preferred_element_type=f32)
    d = jnp.dot(rd_ref[...], x, precision=prec, preferred_element_type=f32)

    # Column analysis: @CL sums even/odd column pairs, @CH differences them.
    ll = jnp.dot(s, cl_ref[...], precision=prec, preferred_element_type=f32)
    hl = jnp.dot(s, ch_ref[...], precision=prec, preferred_element_type=f32)
    lh = jnp.dot(d, cl_ref[...], precision=prec, preferred_element_type=f32)
    hh = jnp.dot(d, ch_ref[...], precision=prec, preferred_element_type=f32)

    ll_ref[0, 0] = ll.astype(ll_ref.dtype)
    hi_ref[0, 0, 0] = hl.astype(hi_ref.dtype)   # HL  -> channels [0, C)
    hi_ref[0, 1, 0] = lh.astype(hi_ref.dtype)   # LH  -> channels [C, 2C)
    hi_ref[0, 2, 0] = hh.astype(hi_ref.dtype)   # HH  -> channels [2C, 3C)


def _haar_matrices(H, W, dtype=jnp.float32):
    H2, W2 = H // 2, W // 2
    # Row matrices (H2, H): RS has +0.5 at (i, 2i) and (i, 2i+1);
    #                       RD has -0.5 at (i, 2i) and +0.5 at (i, 2i+1).
    h = jnp.arange(H)[None, :]
    i = jnp.arange(H2)[:, None]
    r_even = (h == 2 * i).astype(dtype)
    r_odd = (h == 2 * i + 1).astype(dtype)
    rs = 0.5 * (r_even + r_odd)
    rd = 0.5 * (r_odd - r_even)
    # Column matrices (W, W2): CL has +1 at (2k, k) and (2k+1, k);
    #                          CH has -1 at (2k, k) and +1 at (2k+1, k).
    w = jnp.arange(W)[:, None]
    k = jnp.arange(W2)[None, :]
    c_even = (w == 2 * k).astype(dtype)
    c_odd = (w == 2 * k + 1).astype(dtype)
    cl = c_even + c_odd
    ch = c_odd - c_even
    return rs, rd, cl, ch


@jax.jit
def dwt(x):
    """Forward of the PyTorch DWT module. Returns (x_LL, cat(HL, LH, HH))."""
    B, C, H, W = x.shape
    assert H % 2 == 0 and W % 2 == 0, "DWT requires even spatial dims"
    H2, W2 = H // 2, W // 2
    rs, rd, cl, ch = _haar_matrices(H, W)

    ll, hi = pl.pallas_call(
        _dwt_kernel,
        out_shape=(
            jax.ShapeDtypeStruct((B, C, H2, W2), x.dtype),
            jax.ShapeDtypeStruct((B, 3, C, H2, W2), x.dtype),
        ),
        grid_spec=pltpu.PrefetchScalarGridSpec(
            num_scalar_prefetch=0,
            grid=(B, C),          # >= 2 steps -> shards across TCs on v7x
            in_specs=[
                pl.BlockSpec((1, 1, H, W), lambda b, c: (b, c, 0, 0)),
                pl.BlockSpec((H2, H), lambda b, c: (0, 0)),
                pl.BlockSpec((H2, H), lambda b, c: (0, 0)),
                pl.BlockSpec((W, W2), lambda b, c: (0, 0)),
                pl.BlockSpec((W, W2), lambda b, c: (0, 0)),
            ],
            out_specs=[
                pl.BlockSpec((1, 1, H2, W2), lambda b, c: (b, c, 0, 0)),
                pl.BlockSpec((1, 3, 1, H2, W2), lambda b, c: (b, 0, c, 0, 0)),
            ],
        ),
        compiler_params=pltpu.CompilerParams(
            dimension_semantics=("parallel", "parallel"),
        ),
    )(x, rs, rd, cl, ch)

    # (B, 3, C, H2, W2) -> (B, 3C, H2, W2): contiguous (free) reshape whose
    # channel order matches torch.cat((x_HL, x_LH, x_HH), dim=1).
    return ll, hi.reshape(B, 3 * C, H2, W2)


def dwt_ref(x):
    """Pure-JAX reference, a direct transcription of dwt_init()."""
    x01 = x[:, :, 0::2, :] / 2
    x02 = x[:, :, 1::2, :] / 2
    x1 = x01[:, :, :, 0::2]
    x2 = x02[:, :, :, 0::2]
    x3 = x01[:, :, :, 1::2]
    x4 = x02[:, :, :, 1::2]
    x_ll = x1 + x2 + x3 + x4
    x_hl = -x1 - x2 + x3 + x4
    x_lh = -x1 + x2 - x3 + x4
    x_hh = x1 - x2 - x3 + x4
    return x_ll, jnp.concatenate((x_hl, x_lh, x_hh), axis=1)


if __name__ == "__main__":
    key = jax.random.PRNGKey(0)
    x = jax.random.normal(key, (2, 4, 16, 16), dtype=jnp.float32)

    ll, high = dwt(x)
    ll = jax.block_until_ready(ll)
    high = jax.block_until_ready(high)

    ll_ref, high_ref = dwt_ref(x)
    assert ll.shape == (2, 4, 8, 8), ll.shape
    assert high.shape == (2, 12, 8, 8), high.shape
    assert ll.dtype == x.dtype and high.dtype == x.dtype
    assert jnp.allclose(ll, ll_ref, atol=1e-5, rtol=1e-5), "LL mismatch"
    assert jnp.allclose(high, high_ref, atol=1e-5, rtol=1e-5), "high-band mismatch"

    print("KERNEL_OK")
</pallas_src>

<mosaic_0001>
module attributes {stable_mosaic.version = 11 : i64} {
  func.func @_dwt_kernel(%arg0: i32, %arg1: i32, %arg2: memref<1x1x16x16xf32, #tpu.memory_space<vmem>>, %arg3: memref<8x16xf32, #tpu.memory_space<vmem>>, %arg4: memref<8x16xf32, #tpu.memory_space<vmem>>, %arg5: memref<16x8xf32, #tpu.memory_space<vmem>>, %arg6: memref<16x8xf32, #tpu.memory_space<vmem>>, %arg7: memref<1x1x8x8xf32, #tpu.memory_space<vmem>>, %arg8: memref<1x3x1x8x8xf32, #tpu.memory_space<vmem>>) attributes {dimension_semantics = [#tpu.dimension_semantics<parallel>, #tpu.dimension_semantics<parallel>], iteration_bounds = array<i64: 2, 4>, scalar_prefetch = 0 : i64, scratch_operands = 0 : i64, tpu.core_type = #tpu.core_type<tc>, window_params = [{transform_indices = @transform_0, window_bounds = array<i64: 1, 1, 16, 16>}, {pipeline_mode = #tpu.pipeline_mode<synchronous>, transform_indices = @transform_1, window_bounds = array<i64: 8, 16>}, {pipeline_mode = #tpu.pipeline_mode<synchronous>, transform_indices = @transform_2, window_bounds = array<i64: 8, 16>}, {pipeline_mode = #tpu.pipeline_mode<synchronous>, transform_indices = @transform_3, window_bounds = array<i64: 16, 8>}, {pipeline_mode = #tpu.pipeline_mode<synchronous>, transform_indices = @transform_4, window_bounds = array<i64: 16, 8>}, {transform_indices = @transform_5, window_bounds = array<i64: 1, 1, 8, 8>}, {transform_indices = @transform_6, window_bounds = array<i64: 1, 3, 1, 8, 8>}]} {
    %c0 = arith.constant 0 : index
    %c0_0 = arith.constant 0 : index
    %c0_1 = arith.constant 0 : index
    %c0_2 = arith.constant 0 : index
    %0 = vector.load %arg2[%c0, %c0_0, %c0_1, %c0_2] : memref<1x1x16x16xf32, #tpu.memory_space<vmem>>, vector<1x1x16x16xf32>
    %1 = vector.shape_cast %0 : vector<1x1x16x16xf32> to vector<16x16xf32>
    %c0_3 = arith.constant 0 : index
    %c0_4 = arith.constant 0 : index
    %2 = vector.load %arg3[%c0_3, %c0_4] : memref<8x16xf32, #tpu.memory_space<vmem>>, vector<8x16xf32>
    %cst = arith.constant dense<0.000000e+00> : vector<8x16xf32>
    %3 = tpu.matmul %2, %1, %cst {dimension_numbers = #tpu.dot_dimension_numbers<[1], [0], [0], [1], [0, 0, 1, 1], [], []>, precision = #tpu.contract_precision<fp32>} : vector<8x16xf32>, vector<16x16xf32>, vector<8x16xf32> -> vector<8x16xf32>
    %c0_5 = arith.constant 0 : index
    %c0_6 = arith.constant 0 : index
    %4 = vector.load %arg4[%c0_5, %c0_6] : memref<8x16xf32, #tpu.memory_space<vmem>>, vector<8x16xf32>
    %cst_7 = arith.constant dense<0.000000e+00> : vector<8x16xf32>
    %5 = tpu.matmul %4, %1, %cst_7 {dimension_numbers = #tpu.dot_dimension_numbers<[1], [0], [0], [1], [0, 0, 1, 1], [], []>, precision = #tpu.contract_precision<fp32>} : vector<8x16xf32>, vector<16x16xf32>, vector<8x16xf32> -> vector<8x16xf32>
    %c0_8 = arith.constant 0 : index
    %c0_9 = arith.constant 0 : index
    %6 = vector.load %arg5[%c0_8, %c0_9] : memref<16x8xf32, #tpu.memory_space<vmem>>, vector<16x8xf32>
    %cst_10 = arith.constant dense<0.000000e+00> : vector<8x8xf32>
    %7 = tpu.matmul %3, %6, %cst_10 {dimension_numbers = #tpu.dot_dimension_numbers<[1], [0], [0], [1], [0, 0, 1, 1], [], []>, precision = #tpu.contract_precision<fp32>} : vector<8x16xf32>, vector<16x8xf32>, vector<8x8xf32> -> vector<8x8xf32>
    %c0_11 = arith.constant 0 : index
    %c0_12 = arith.constant 0 : index
    %8 = vector.load %arg6[%c0_11, %c0_12] : memref<16x8xf32, #tpu.memory_space<vmem>>, vector<16x8xf32>
    %cst_13 = arith.constant dense<0.000000e+00> : vector<8x8xf32>
    %9 = tpu.matmul %3, %8, %cst_13 {dimension_numbers = #tpu.dot_dimension_numbers<[1], [0], [0], [1], [0, 0, 1, 1], [], []>, precision = #tpu.contract_precision<fp32>} : vector<8x16xf32>, vector<16x8xf32>, vector<8x8xf32> -> vector<8x8xf32>
    %c0_14 = arith.constant 0 : index
    %c0_15 = arith.constant 0 : index
    %10 = vector.load %arg5[%c0_14, %c0_15] : memref<16x8xf32, #tpu.memory_space<vmem>>, vector<16x8xf32>
    %cst_16 = arith.constant dense<0.000000e+00> : vector<8x8xf32>
    %11 = tpu.matmul %5, %10, %cst_16 {dimension_numbers = #tpu.dot_dimension_numbers<[1], [0], [0], [1], [0, 0, 1, 1], [], []>, precision = #tpu.contract_precision<fp32>} : vector<8x16xf32>, vector<16x8xf32>, vector<8x8xf32> -> vector<8x8xf32>
    %c0_17 = arith.constant 0 : index
    %c0_18 = arith.constant 0 : index
    %12 = vector.load %arg6[%c0_17, %c0_18] : memref<16x8xf32, #tpu.memory_space<vmem>>, vector<16x8xf32>
    %cst_19 = arith.constant dense<0.000000e+00> : vector<8x8xf32>
    %13 = tpu.matmul %5, %12, %cst_19 {dimension_numbers = #tpu.dot_dimension_numbers<[1], [0], [0], [1], [0, 0, 1, 1], [], []>, precision = #tpu.contract_precision<fp32>} : vector<8x16xf32>, vector<16x8xf32>, vector<8x8xf32> -> vector<8x8xf32>
    %c0_20 = arith.constant 0 : index
    %c0_21 = arith.constant 0 : index
    %c0_22 = arith.constant 0 : index
    %c0_23 = arith.constant 0 : index
    %14 = vector.load %arg7[%c0_20, %c0_21, %c0_22, %c0_23] : memref<1x1x8x8xf32, #tpu.memory_space<vmem>>, vector<1x1x8x8xf32>
    %15 = vector.shape_cast %14 : vector<1x1x8x8xf32> to vector<8x8xf32>
    %16 = vector.shape_cast %7 : vector<8x8xf32> to vector<1x1x8x8xf32>
    tpu.vector_store %arg7[%c0_20, %c0_21, %c0_22, %c0_23], %16 {strides = array<i32>} : memref<1x1x8x8xf32, #tpu.memory_space<vmem>>, vector<1x1x8x8xf32>,
    %c0_24 = arith.constant 0 : index
    %c0_25 = arith.constant 0 : index
    %c0_26 = arith.constant 0 : index
    %c0_27 = arith.constant 0 : index
    %c0_28 = arith.constant 0 : index
    %17 = vector.load %arg8[%c0_24, %c0_25, %c0_26, %c0_27, %c0_28] : memref<1x3x1x8x8xf32, #tpu.memory_space<vmem>>, vector<1x1x1x8x8xf32>
    %18 = vector.shape_cast %17 : vector<1x1x1x8x8xf32> to vector<8x8xf32>
    %19 = vector.shape_cast %9 : vector<8x8xf32> to vector<1x1x1x8x8xf32>
    tpu.vector_store %arg8[%c0_24, %c0_25, %c0_26, %c0_27, %c0_28], %19 {strides = array<i32>} : memref<1x3x1x8x8xf32, #tpu.memory_space<vmem>>, vector<1x1x1x8x8xf32>,
    %c0_29 = arith.constant 0 : index
    %c1 = arith.constant 1 : index
    %c0_30 = arith.constant 0 : index
    %c0_31 = arith.constant 0 : index
    %c0_32 = arith.constant 0 : index
    %20 = vector.load %arg8[%c0_29, %c1, %c0_30, %c0_31, %c0_32] : memref<1x3x1x8x8xf32, #tpu.memory_space<vmem>>, vector<1x1x1x8x8xf32>
    %21 = vector.shape_cast %20 : vector<1x1x1x8x8xf32> to vector<8x8xf32>
    %22 = vector.shape_cast %11 : vector<8x8xf32> to vector<1x1x1x8x8xf32>
    tpu.vector_store %arg8[%c0_29, %c1, %c0_30, %c0_31, %c0_32], %22 {strides = array<i32>} : memref<1x3x1x8x8xf32, #tpu.memory_space<vmem>>, vector<1x1x1x8x8xf32>,
    %c0_33 = arith.constant 0 : index
    %c2 = arith.constant 2 : index
    %c0_34 = arith.constant 0 : index
    %c0_35 = arith.constant 0 : index
    %c0_36 = arith.constant 0 : index
    %23 = vector.load %arg8[%c0_33, %c2, %c0_34, %c0_35, %c0_36] : memref<1x3x1x8x8xf32, #tpu.memory_space<vmem>>, vector<1x1x1x8x8xf32>
    %24 = vector.shape_cast %23 : vector<1x1x1x8x8xf32> to vector<8x8xf32>
    %25 = vector.shape_cast %13 : vector<8x8xf32> to vector<1x1x1x8x8xf32>
    tpu.vector_store %arg8[%c0_33, %c2, %c0_34, %c0_35, %c0_36], %25 {strides = array<i32>} : memref<1x3x1x8x8xf32, #tpu.memory_space<vmem>>, vector<1x1x1x8x8xf32>,
    return
  }
  func.func @transform_0(%arg0: i32, %arg1: i32) -> (i32, i32, i32, i32) {
    %c0_i32 = arith.constant 0 : i32
    %c0_i32_0 = arith.constant 0 : i32
    %c0_i32_1 = arith.constant 0 : i32
    return %arg0, %arg1, %c0_i32, %c0_i32_0 : i32, i32, i32, i32
  }
  func.func @transform_1(%arg0: i32, %arg1: i32) -> (i32, i32) {
    %c0_i32 = arith.constant 0 : i32
    %c0_i32_0 = arith.constant 0 : i32
    %c0_i32_1 = arith.constant 0 : i32
    return %c0_i32, %c0_i32_0 : i32, i32
  }
  func.func @transform_2(%arg0: i32, %arg1: i32) -> (i32, i32) {
    %c0_i32 = arith.constant 0 : i32
    %c0_i32_0 = arith.constant 0 : i32
    %c0_i32_1 = arith.constant 0 : i32
    return %c0_i32, %c0_i32_0 : i32, i32
  }
  func.func @transform_3(%arg0: i32, %arg1: i32) -> (i32, i32) {
    %c0_i32 = arith.constant 0 : i32
    %c0_i32_0 = arith.constant 0 : i32
    %c0_i32_1 = arith.constant 0 : i32
    return %c0_i32, %c0_i32_0 : i32, i32
  }
  func.func @transform_4(%arg0: i32, %arg1: i32) -> (i32, i32) {
    %c0_i32 = arith.constant 0 : i32
    %c0_i32_0 = arith.constant 0 : i32
    %c0_i32_1 = arith.constant 0 : i32
    return %c0_i32, %c0_i32_0 : i32, i32
  }
  func.func @transform_5(%arg0: i32, %arg1: i32) -> (i32, i32, i32, i32) {
    %c0_i32 = arith.constant 0 : i32
    %c0_i32_0 = arith.constant 0 : i32
    %c0_i32_1 = arith.constant 0 : i32
    return %arg0, %arg1, %c0_i32, %c0_i32_0 : i32, i32, i32, i32
  }
  func.func @transform_6(%arg0: i32, %arg1: i32) -> (i32, i32, i32, i32, i32) {
    %c0_i32 = arith.constant 0 : i32
    %c0_i32_0 = arith.constant 0 : i32
    %c0_i32_1 = arith.constant 0 : i32
    %c0_i32_2 = arith.constant 0 : i32
    return %arg0, %c0_i32, %arg1, %c0_i32_0, %c0_i32_1 : i32, i32, i32, i32, i32
  }
}

</mosaic_0001>

<bundles_post_ra>
// kernel: dwt.1
= control target key start
LH: loop header
LB: loop body
LE: loop exit
PB: predicated region body
PF: predicated region fallthrough
CT: control target
= control target key end

     0   :  { %s4465_s0 = inlined_call_operand.hbm [shape: f32[2,4,16,16], index: 0, kind: input, shape index: {}]   ;;  %s4466_s1 = inlined_call_operand.vmem [shape: f32[8,16], index: 1, kind: input, shape index: {}]   ;;  %s4467_s2 = inlined_call_operand.vmem [shape: f32[8,16], index: 2, kind: input, shape index: {}]   ;;  %s4468_s3 = inlined_call_operand.vmem [shape: f32[16,8], index: 3, kind: input, shape index: {}]   ;;  %s4469_s4 = inlined_call_operand.vmem [shape: f32[16,8], index: 4, kind: input, shape index: {}]   ;;  %s4470_s5 = inlined_call_operand.hbm [shape: f32[2,4,8,8], index: 5, kind: output, shape index: {0}]   ;;  %s4471_s6 = inlined_call_operand.vmem [shape: f32[2,3,4,8,8], index: 6, kind: output, shape index: {1}]  }
   0x1   :  { %4476 = sst [smem:[#allocation12_spill]] %s4471_s6 }
   0x2   :  { %12 = vsyncpa [#allocation3], 0 }
   0x3   :  { %14 = vsyncpa [#allocation3 + $0x1], 0 }
   0x4   :  { %15 = vsyncpa [#allocation4], 0 }
   0x5   :  { %17 = vsyncpa [#allocation4 + $0x1], 0  ;;  %s4066_s21 = smov 0   ;;  %s4068_s22 = smov 0  }
   0x6   :  { %s4070_s23 = smov 0   ;;  %s4072_s24 = smov 0  }
   0x7   :  { %s4074_s25 = smov 0   ;;  %s4076_s26 = smov 0  }
   0x8   :  { %s4078_s27 = smov 0   ;;  %s4080_s28 = smov 0  }
   0x9 LB: > { %4477 = sst [smem:[#allocation9_spill]] %s3994_s21  ;;  %s3262_s29 = sadd.s32 4294967295, %s4022_s28   ;;  %s4022_s28 = sphi %s4080_s28, %s23_s28   ;;  %s4018_s27 = sphi %s4078_s27, %s4497_s27   ;;  %s4014_s26 = sphi %s4076_s26, %s4496_s26   ;;  %s4010_s25 = sphi %s4074_s25, %s4495_s25   ;;  %s4006_s24 = sphi %s4072_s24, %s4494_s24   ;;  %s4002_s23 = sphi %s4070_s23, %s4493_s23   ;;  %s3998_s22 = sphi %s4068_s22, %s4492_s22   ;;  %s3994_s21 = sphi %s4066_s21, %s4491_s21  }
   0xa   : > { %s3263_s30 = sadd.s32 4294967294, %s4022_s28   ;;  %s32_s7 = sadd.s32 1, %s4014_s26 }
   0xb   : > { %s35_s8 = sadd.s32 1, %s4018_s27  ;;  %p33_p0 = scmp.ge.s32.totalorder %s32_s7, 4 }
   0xc   : > { %s44_s9 = sadd.s32 1, %s4002_s23  ;;  %p51_p1 = scmp.ne.s32.totalorder %s4002_s23, %s3998_s22 }
   0xd   : > { %p52_p2 = scmp.eq.s32.totalorder %s4022_s28, 0  ;;  %s4499_s7 = smov (%p33_p0, %s32_s7), 0 }
   0xe   : > { %4478 = sst [smem:[#allocation10_spill]] %s4499_s7  ;;  %s4501_s8 = smov (!%p33_p0, %s35_s8), %s4018_s27 }
   0xf   : > { %s40_s10 = ssub.s32 %s4014_s26, %s4499_s7  ;;  %p4119_p3 = por %p52_p2, %p51_p1 }
  0x10   : > { %p37_p4 = scmp.ge.s32.totalorder %s4501_s8, 2  ;;  %p57_p5 = scmp.ne.s32.totalorder %s3998_s22, %s3994_s21 }
  0x11   : > { %p58_p6 = scmp.eq.s32.totalorder %s3262_s29, 0  ;;  %p167_p7 = scmp.eq.s32.totalorder %s3262_s29, 7 }
  0x12   : > { %s4503_s8 = smov (%p37_p4, %s4501_s8), 0  ;;  %p173_p10 = scmp.eq.s32.totalorder %s3263_s30, 7 }
  0x13   : > { %4480 = sst [smem:[#allocation11_spill]] %s4503_s8  ;;  %p4127_p8 = por %p58_p6, %p57_p5 }
  0x14   : > { %p4131_p9 = por %p167_p7, %p51_p1  ;;  %s39_s14 = ssub.s32 %s4018_s27, %s4503_s8 }
  0x15   : > { %s41_s15 = sor.u32 %s40_s10, %s39_s14  ;;  %p4137_p12 = por %p173_p10, %p57_p5 }
  0x16   : > { %s4482_s13 = scalar_select %p4131_p9, 1, 0 }
  0x17   : > { %p42_p11 = scmp.eq.s32.totalorder %s41_s15, 0  ;;  %p3823_p13 = scmp.lt.s32.totalorder %s4022_s28, 8 }
  0x18   : > { %s4483_s16 = scalar_select %p4137_p12, 1, 0 }
  0x19   : > { %s233_s17 = sand.u32 1, %s4002_s23   ;;  %s3267_s20 = sshll.u32 %s4014_s26, 1 }
  0x1a   : > { %s4144_s18 = scalar_select %p42_p11, %s4002_s23, %s44_s9  }
  0x1b   : > { %s3266_s19 = sshll.u32 %s233_s17, 4  ;;  %s3268_s29 = sshll.u32 %s4018_s27, 3 }
  0x1c   : > { %s237_s7 = scalar_lea.vmem [#allocation2], %s3266_s19  ;;  %s243_s6 = sadd.s32 %s3268_s29, %s3267_s20 }
  0x1d   : > { %s246_s21 = sshll.u32 %s237_s7, 4  ;;  %s3269_s8 = sshll.u32 %s243_s6, 7  ;;  %s4148_s21 = int_to_ptr.vmem [resolvable:$true] %s246_s21 }
  0x1e   : > { %p4152_p0 = pnand %p3823_p13, %p4119_p3  ;;  %s4159_s9 = scalar_lea.hbm %s4465_s0, %s3269_s8 }
  0x1f   : > { %s4161_s7 = scalar_lea.sflag [#allocation3], %s233_s17  ;;  %s3894_s15 = scalar_lea.hbm %s4159_s9, 256 }
  0x20   : > { %p3895_p1 = scmp.ne.s32.totalorder %s4159_s9, %s3894_s15  ;;  %p3896_p2 = pneg %p4152_p0 }
  0x21   : > { %s3899_s19 = scalar_lea.hbm %s4465_s0, 2048  ;;  %p3900_p5 = scmp.lt.u32.totalorder %s4159_s9, %s4465_s0 }
  0x22   : > { %p3897_p3 = pnand %p3896_p2, %p3895_p1  ;;  %p3901_p6 = scmp.lt.u32.totalorder %s3899_s19, %s3894_s15 }
  0x23   : > { %p3903_p10 = scmp.lt.u32.totalorder %s3894_s15, %s4159_s9 }
  0x24   : > { %p3898_p4 = pneg %p3897_p3  ;;  %p3902_p7 = por %p3901_p6, %p3900_p5 }
  0x26   : > { %p3904_p11 = por %p3903_p10, %p3902_p7 }
  0x28   : > { %p3905_p13 = pnand %p3904_p11, %p3898_p4 }
  0x2a   : > { %3908 = shalt.err (!%p3905_p13)
}
  0x2b   : > { %s3909_s17 = scalar_lea.vmem %s4148_s21, 256  ;;  %s4024_s29 = smov [#allocation2]  }
  0x2c   : > { %p3910_p1 = scmp.ne.s32.totalorder %s4148_s21, %s3909_s17  ;;  %s3914_s10 = sshll.u32 %s4024_s29, 4  ;;  %s3915_s10 = int_to_ptr.vmem [resolvable:$false] %s3914_s10 }
  0x2d   : > { %s3916_s14 = scalar_lea.vmem %s3915_s10, 512  ;;  %p3917_p9 = scmp.lt.s32.totalorder %s4148_s21, %s3915_s10 }
  0x2e   : > { %p3912_p3 = pnand %p3910_p1, %p3896_p2  ;;  %p3918_p5 = scmp.lt.s32.totalorder %s3916_s14, %s3909_s17 }
  0x30   : > { %p3913_p12 = pneg %p3912_p3  ;;  %p3919_p6 = por %p3918_p5, %p3917_p9 }
  0x32   : > { %p3920_p7 = pnand %p3919_p6, %p3913_p12 }
  0x34   : > { %3923 = shalt.err (!%p3920_p7)
}
  0x35   : > { %s4025_s15 = smov 128   ;;  %s4026_s6 = smov 8  }
  0x36   : > { %3818 = dma.hbm_to_vmem [thread:$0]  (!%p4152_p0), %s4159_s9, 256, %s4148_s21, %s4161_s7, %s4025_s15, %s4025_s15, %s4026_s6  }
  0x37   : > { %p3270_p2 = scmp.ge.s32.totalorder %s4022_s28, 1  ;;  %p254_p4 = scmp.lt.s32.totalorder %s4022_s28, 9 }
  0x39   : > { %p255_p10 = pnand %p3270_p2, %p254_p4 }
  0x3a   : > { %s4192_s11 = sand.u32 (!%p255_p10), 1, %s3998_s22  }
  0x3b   : > { %258 = sbr.rel (%p255_p10) target bundleno = 648 (0x288), region = 40  ;;  %s3271_s19 = sshll.u32 (!%p255_p10), %s4192_s11, 4 }
  0x3c   : > { %s261_s8 = scalar_lea.sflag (!%p255_p10), [#allocation3], %s4192_s11  ;;  %s264_s20 = scalar_lea.vmem (!%p255_p10), [#allocation2], %s3271_s19 }
  0x42   : > { %3985 = dma.done.wait (%p4127_p8), %s261_s8, 256  }
  0x43   : > { %3987 = vsyncadd (%p4127_p8), %s261_s8, 4294967040  ;;  %v4027_v0 = vmov 0.0|0.0   ;;  %vm4028_vm0 = vmmov 0   ;;  %v4029_v1 = vmov 0.0   ;;  %vm300_vm1 = vcmask 130048   ;;  %v297_v2 = vld [vmem:[%s264_s20] sm:$0xff] }
  0x44   : > { %3641 = vmatprep.subr.bf16.mxu0 %v4027_v0  ;;  %3659 = vmatprep.subr.bf16.mxu1 %v4027_v0  ;;  %v298_v3 = vld [vmem:[%s264_s20 + $0x8] sm:$0xff]  ;;  %v299_v4 = vld [vmem:[%s4466_s1] sm:$0xff]  ;;  %v305_v5 = vand.u32 4294901760, %v297_v2  ;;  %s3276_s8 = sshll.u32 %s4010_s25, 2  ;;  %s3272_s20 = sshll.u32 %s4192_s11, 3  ;;  %vm3072_vm2 = vcmask 64512  }
  0x45   : > { %3393 = vmatprep.mubr.msk.f32.mxu0 %vm4028_vm0, %v4029_v1  ;;  %3435 = vmatprep.mubr.msk.f32.mxu1 %vm4028_vm0, %v4029_v1  ;;  %v308_v6 = vand.u32 4294901760, %v298_v3  ;;  %v302_v7 = vsel %vm300_vm1, %v299_v4, 0  ;;  %v763_v8 = vld [vmem:[%s4467_s2] sm:$0xff]  ;;  %v1227_v33 = vld [vmem:[%s4468_s3 + $0x8] sm:$0xff]  ;;  %s3095_s21 = sadd.s32 %s4006_s24, %s3276_s8  ;;  %s3809_s30 = smul.u32 24, %s4192_s11 }
  0x46   : > { %v4213_v9 = vand.u32 4294901760, %v302_v7  ;;  %v765_v10 = vsel %vm300_vm1, %v763_v8, 0  ;;  %v383_v12 = vsub.f32 %v297_v2, %v305_v5  ;;  %v1226_v32 = vld [vmem:[%s4468_s3] sm:$0xff]  ;;  %v1235_v36 = vand.u32 4294901760, %v1227_v33  ;;  %v1691_v37 = vld [vmem:[%s4469_s4 + $0x8] sm:$0xff]  ;;  %s3277_s12 = sshll.u32 %s3095_s21, 7 }
  0x47   : > { %v3642_v11 = vpack.c.bf16 %v308_v6, %v305_v5  ;;  %v390_v13 = vsub.f32 %v298_v3, %v308_v6  ;;  %v834_v14 = vand.u32 4294901760, %v765_v10  ;;  %v1690_v34 = vld [vmem:[%s4469_s4] sm:$0xff]  ;;  %v1232_v35 = vand.u32 4294901760, %v1226_v32  ;;  %s290_s9 = scalar_lea.vmem [#allocation5], %s3272_s20  ;;  %s4392_s10 = scalar_lea.hbm %s4470_s5, %s3277_s12 }
  0x48   : > { %v372_v15 = vsub.f32 %v302_v7, %v4213_v9  ;;  %v384_v16 = vand.u32 4294901760, %v383_v12  ;;  %v1693_v38 = vand.u32 4294901760, %v1690_v34  ;;  %v1696_v39 = vand.u32 4294901760, %v1691_v37  ;;  %s3099_s7 = sshll.u32 %s290_s9, 4  ;;  %s4397_s14 = scalar_lea.vmem [#allocation6], %s3809_s30  ;;  %s4394_s7 = int_to_ptr.vmem [resolvable:$true] %s3099_s7 }
  0x49   : > { %3643 = vmatpush3.bf16.msra.mxu0 %v3642_v11  ;;  %3661 = vmatpush3.bf16.msra.mxu1 %v3642_v11  ;;  %v391_v17 = vand.u32 4294901760, %v390_v13  ;;  %v835_v18 = vsub.f32 %v765_v10, %v834_v14  ;;  %v3648_v30 = vpack.c.bf16 %v390_v13, %v383_v12  ;;  %v4268_v40 = vpack.c.bf16 %v1235_v36, %v1232_v35  ;;  %s3080_s15 = scalar_lea.sflag [#allocation4], %s4192_s11  ;;  %s3924_s6 = scalar_lea.vmem %s4394_s7, 128 }
  0x4a   : > { %v373_v19 = vand.u32 4294901760, %v372_v15  ;;  %3644 = vmatprep.subr.bf16.mxu0 %v4027_v0  ;;  %3662 = vmatprep.subr.bf16.mxu1 %v4027_v0  ;;  %v385_v20 = vsub.f32 %v383_v12, %v384_v16  ;;  %v1310_v41 = vsub.f32 %v1226_v32, %v1232_v35  ;;  %v1317_v42 = vsub.f32 %v1227_v33, %v1235_v36  ;;  %p3925_p8 = scmp.ne.s32.totalorder %s4394_s7, %s3924_s6  ;;  %p4485_p9 = scmp.ne.s32.totalorder %s4482_s13, 0 }
  0x4b   : > { %v392_v21 = vsub.f32 %v390_v13, %v391_v17  ;;  %v836_v22 = vand.u32 4294901760, %v835_v18  ;;  %v3654_v31 = vpack.c.bf16 %v391_v17, %v384_v16  ;;  %v1771_v43 = vsub.f32 %v1690_v34, %v1693_v38  ;;  %s4030_s19 = smov [#allocation5]  }
  0x4c   : > { %v374_v23 = vsub.f32 %v372_v15, %v373_v19  ;;  %v386_v24 = vand.u32 4294901760, %v385_v20  ;;  %v4270_v44 = vpack.c.bf16 %v1696_v39, %v1693_v38  ;;  %v1778_v45 = vsub.f32 %v1691_v37, %v1696_v39  ;;  %p3926_p12 = pnand %p3925_p8, %p4485_p9  ;;  %s3928_s8 = sshll.u32 %s4030_s19, 4  ;;  %s3929_s8 = int_to_ptr.vmem [resolvable:$false] %s3928_s8 }
  0x4d   : > { %v393_v25 = vand.u32 4294901760, %v392_v21  ;;  %v837_v26 = vsub.f32 %v835_v18, %v836_v22  ;;  %v1311_v46 = vand.u32 4294901760, %v1310_v41  ;;  %v1318_v47 = vand.u32 4294901760, %v1317_v42  ;;  %s3930_s20 = scalar_lea.vmem %s3929_s8, 256  ;;  %p3931_p11 = scmp.lt.s32.totalorder %s4394_s7, %s3929_s8 }
  0x4e   : > { %v375_v27 = vand.u32 4294901760, %v374_v23  ;;  %v1772_v48 = vand.u32 4294901760, %v1771_v43  ;;  %v1779_v49 = vand.u32 4294901760, %v1778_v45  ;;  %v4280_v60 = vpack.c.bf16 %v1317_v42, %v1310_v41  ;;  %p3927_p0 = pneg %p3926_p12  ;;  %p3932_p13 = scmp.lt.s32.totalorder %s3930_s20, %s3924_s6 }
  0x4f   : > { %v3645_v28 = vpack.c.bf16 %v393_v25, %v386_v24  ;;  %v838_v29 = vand.u32 4294901760, %v837_v26  ;;  %v1312_v50 = vsub.f32 %v1310_v41, %v1311_v46  ;;  %v1319_v51 = vsub.f32 %v1317_v42, %v1318_v47 }
  0x50   : > { %3394 = vmatmul.mubr.f32.vlgmr.msra.gmra.mrb[0].mxu0 %v375_v27  ;;  %v1773_v52 = vsub.f32 %v1771_v43, %v1772_v48  ;;  %v1780_v53 = vsub.f32 %v1778_v45, %v1779_v49  ;;  %v4282_v61 = vpack.c.bf16 %v1778_v45, %v1771_v43  ;;  %v4284_v62 = vpack.c.bf16 %v1318_v47, %v1311_v46  ;;  %p3933_p1 = por %p3932_p13, %p3931_p11 }
  0x51   : > { %3646 = vmatpush3.bf16.msra.mxu0 %v3645_v28  ;;  %3436 = vmatmul.mubr.f32.vlgmr.msra.gmra.mrb[0].mxu1 %v838_v29  ;;  %v1313_v54 = vand.u32 4294901760, %v1312_v50  ;;  %v1320_v55 = vand.u32 4294901760, %v1319_v51  ;;  %v4286_v63 = vpack.c.bf16 %v1779_v49, %v1772_v48 }
  0x52   : > { %3664 = vmatpush3.bf16.msra.mxu1 %v3645_v28  ;;  %3400 = vmatprep.mubr.msk.f32.mxu0 %vm4028_vm0, %v4029_v1  ;;  %v1774_v56 = vand.u32 4294901760, %v1773_v52  ;;  %v1781_v57 = vand.u32 4294901760, %v1780_v53  ;;  %p3934_p3 = pnand %p3933_p1, %p3927_p0 }
  0x53   : > { %3647 = vmatprep.subr.bf16.mxu0 %v4027_v0  ;;  %3442 = vmatprep.mubr.msk.f32.mxu1 %vm4028_vm0, %v4029_v1  ;;  %v4276_v58 = vpack.c.bf16 %v1320_v55, %v1313_v54 }
  0x54   : > { %3665 = vmatprep.subr.bf16.mxu1 %v4027_v0  ;;  %v4278_v59 = vpack.c.bf16 %v1781_v57, %v1774_v56 }
  0x58   : > { %3401 = vmatmul.mubr.f32.vlgmr.msra.gmra.mrb[0].mxu0 %v4213_v9 }
  0x59   : > { %3649 = vmatpush3.bf16.msra.mxu0 %v3648_v30  ;;  %3443 = vmatmul.mubr.f32.vlgmr.msra.gmra.mrb[0].mxu1 %v834_v14 }
  0x5a   : > { %3667 = vmatpush3.bf16.msra.mxu1 %v3648_v30  ;;  %3407 = vmatprep.mubr.msk.f32.mxu0 %vm4028_vm0, %v4029_v1 }
  0x5b   : > { %3650 = vmatprep.subr.bf16.mxu0 %v4027_v0  ;;  %3449 = vmatprep.mubr.msk.f32.mxu1 %vm4028_vm0, %v4029_v1 }
  0x5c   : > { %3668 = vmatprep.subr.bf16.mxu1 %v4027_v0 }
  0x60   : > { %3408 = vmatmul.mubr.f32.vlgmr.msra.gmra.mrb[0].mxu0 %v372_v15 }
  0x61   : > { %3652 = vmatpush3.bf16.msra.mxu0 %v3642_v11  ;;  %3450 = vmatmul.mubr.f32.vlgmr.msra.gmra.mrb[0].mxu1 %v835_v18 }
  0x62   : > { %3670 = vmatpush3.bf16.msra.mxu1 %v3642_v11  ;;  %3414 = vmatprep.mubr.msk.f32.mxu0 %vm4028_vm0, %v4029_v1 }
  0x63   : > { %3653 = vmatprep.subr.bf16.mxu0 %v4027_v0  ;;  %3456 = vmatprep.mubr.msk.f32.mxu1 %vm4028_vm0, %v4029_v1 }
  0x64   : > { %3671 = vmatprep.subr.bf16.mxu1 %v4027_v0 }
  0x68   : > { %3415 = vmatmul.mubr.f32.vlgmr.msra.gmra.mrb[0].mxu0 %v373_v19 }
  0x69   : > { %3655 = vmatpush3.bf16.msra.mxu0 %v3654_v31  ;;  %3457 = vmatmul.mubr.f32.vlgmr.msra.gmra.mrb[0].mxu1 %v836_v22 }
  0x6a   : > { %3673 = vmatpush3.bf16.msra.mxu1 %v3654_v31  ;;  %3421 = vmatprep.mubr.msk.f32.mxu0 %vm4028_vm0, %v4029_v1 }
  0x6b   : > { %3656 = vmatprep.subr.bf16.mxu0 %v4027_v0  ;;  %3463 = vmatprep.mubr.msk.f32.mxu1 %vm4028_vm0, %v4029_v1 }
  0x6c   : > { %3674 = vmatprep.subr.bf16.mxu1 %v4027_v0 }
  0x70   : > { %3422 = vmatmul.mubr.f32.vlgmr.msra.gmra.mrb[0].mxu0 %v4213_v9 }
  0x71   : > { %3658 = vmatpush3.bf16.msra.mxu0 %v3642_v11  ;;  %3464 = vmatmul.mubr.f32.vlgmr.msra.gmra.mrb[0].mxu1 %v834_v14 }
  0x72   : > { %3676 = vmatpush3.bf16.msra.mxu1 %v3642_v11  ;;  %3428 = vmatprep.mubr.msk.f32.mxu0 %vm4028_vm0, %v4029_v1 }
  0x73   : > { %3470 = vmatprep.mubr.msk.f32.mxu1 %vm4028_vm0, %v4029_v1  ;;  %3677 = vmatprep.subr.bf16.mxu0 %v4027_v0 }
  0x74   : > { %3695 = vmatprep.subr.bf16.mxu1 %v4027_v0 }
  0x78   : > { %3429 = vmatmul.mubr.f32.vlgmr.msra.gmra.mrb[0].mxu0 %v4213_v9 }
  0x79   : > { %3471 = vmatmul.mubr.f32.vlgmr.msra.gmra.mrb[0].mxu1 %v834_v14  ;;  %3477 = vmatprep.mubr.msk.f32.mxu0 %vm4028_vm0, %v4029_v1 }
  0x7a   : > { %3519 = vmatprep.mubr.msk.f32.mxu1 %vm4028_vm0, %v4029_v1  ;;  %3679 = vmatpush3.bf16.msra.mxu0 %v4268_v40 }
  0x7b   : > { %3697 = vmatpush3.bf16.msra.mxu1 %v4270_v44  ;;  %3680 = vmatprep.subr.bf16.mxu0 %v4027_v0 }
  0x7c   : > { %3698 = vmatprep.subr.bf16.mxu1 %v4027_v0 }
 0x14b   : > { %v759_v2 = vpop.f32.mrb[0].mxu0 }
 0x14c   : > { %v1229_v3 = vsel %vm300_vm1, %v759_v2, 0  ;;  %v3430_v4 = vpop.f32.mrb[1].mxu0  ;;  %v1222_v5 = vpop.f32.mrb[0].mxu1 }
 0x14d   : > { %v1298_v6 = vand.u32 4294901760, %v1229_v3  ;;  %v3472_v7 = vpop.f32.mrb[1].mxu1  ;;  %v2152_v12 = vsel %vm300_vm1, %v1222_v5, 0 }
 0x14e   : > { %v4316_v13 = vand.u32 4294901760, %v2152_v12 }
 0x14f   : > { %v1299_v8 = vsub.f32 %v1229_v3, %v1298_v6 }
 0x150   : > { %v2222_v14 = vsub.f32 %v2152_v12, %v4316_v13 }
 0x151   : > { %v1300_v9 = vand.u32 4294901760, %v1299_v8 }
 0x152   : > { %v2223_v15 = vand.u32 4294901760, %v2222_v14 }
 0x153   : > { %v1301_v10 = vsub.f32 %v1299_v8, %v1300_v9 }
 0x154   : > { %v2224_v16 = vsub.f32 %v2222_v14, %v2223_v15 }
 0x155   : > { %v1302_v11 = vand.u32 4294901760, %v1301_v10 }
 0x156   : > { %v2225_v17 = vand.u32 4294901760, %v2224_v16 }
 0x157   : > { %3478 = vmatmul.mubr.f32.vlgmr.msra.gmra.mrb[2].mxu0 %v1302_v11  ;;  %3520 = vmatmul.mubr.f32.vlgmr.msra.gmra.mrb[2].mxu1 %v1302_v11 }
 0x158   : > { %3682 = vmatpush3.bf16.msra.mxu0 %v4276_v58  ;;  %3700 = vmatpush3.bf16.msra.mxu1 %v4278_v59 }
 0x159   : > { %3484 = vmatprep.mubr.msk.f32.mxu0 %vm4028_vm0, %v4029_v1  ;;  %3526 = vmatprep.mubr.msk.f32.mxu1 %vm4028_vm0, %v4029_v1 }
 0x15a   : > { %3683 = vmatprep.subr.bf16.mxu0 %v4027_v0  ;;  %3701 = vmatprep.subr.bf16.mxu1 %v4027_v0 }
 0x15f   : > { %3485 = vmatmul.mubr.f32.vlgmr.msra.gmra.mrb[2].mxu0 %v1298_v6  ;;  %3527 = vmatmul.mubr.f32.vlgmr.msra.gmra.mrb[2].mxu1 %v1298_v6 }
 0x160   : > { %3685 = vmatpush3.bf16.msra.mxu0 %v4280_v60  ;;  %3703 = vmatpush3.bf16.msra.mxu1 %v4282_v61 }
 0x161   : > { %3491 = vmatprep.mubr.msk.f32.mxu0 %vm4028_vm0, %v4029_v1  ;;  %3533 = vmatprep.mubr.msk.f32.mxu1 %vm4028_vm0, %v4029_v1 }
 0x162   : > { %3686 = vmatprep.subr.bf16.mxu0 %v4027_v0  ;;  %3704 = vmatprep.subr.bf16.mxu1 %v4027_v0 }
 0x167   : > { %3492 = vmatmul.mubr.f32.vlgmr.msra.gmra.mrb[2].mxu0 %v1299_v8  ;;  %3534 = vmatmul.mubr.f32.vlgmr.msra.gmra.mrb[2].mxu1 %v1299_v8 }
 0x168   : > { %3688 = vmatpush3.bf16.msra.mxu0 %v4268_v40  ;;  %3706 = vmatpush3.bf16.msra.mxu1 %v4270_v44 }
 0x169   : > { %3498 = vmatprep.mubr.msk.f32.mxu0 %vm4028_vm0, %v4029_v1  ;;  %3540 = vmatprep.mubr.msk.f32.mxu1 %vm4028_vm0, %v4029_v1 }
 0x16a   : > { %3689 = vmatprep.subr.bf16.mxu0 %v4027_v0  ;;  %3707 = vmatprep.subr.bf16.mxu1 %v4027_v0 }
 0x16f   : > { %3499 = vmatmul.mubr.f32.vlgmr.msra.gmra.mrb[2].mxu0 %v1300_v9  ;;  %3541 = vmatmul.mubr.f32.vlgmr.msra.gmra.mrb[2].mxu1 %v1300_v9 }
 0x170   : > { %3691 = vmatpush3.bf16.msra.mxu0 %v4284_v62  ;;  %3709 = vmatpush3.bf16.msra.mxu1 %v4286_v63 }
 0x171   : > { %3505 = vmatprep.mubr.msk.f32.mxu0 %vm4028_vm0, %v4029_v1  ;;  %3547 = vmatprep.mubr.msk.f32.mxu1 %vm4028_vm0, %v4029_v1 }
 0x172   : > { %3692 = vmatprep.subr.bf16.mxu0 %v4027_v0  ;;  %3710 = vmatprep.subr.bf16.mxu1 %v4027_v0 }
 0x177   : > { %3506 = vmatmul.mubr.f32.vlgmr.msra.gmra.mrb[2].mxu0 %v1298_v6  ;;  %3548 = vmatmul.mubr.f32.vlgmr.msra.gmra.mrb[2].mxu1 %v1298_v6 }
 0x178   : > { %3694 = vmatpush3.bf16.msra.mxu0 %v4268_v40  ;;  %3712 = vmatpush3.bf16.msra.mxu1 %v4270_v44 }
 0x179   : > { %3512 = vmatprep.mubr.msk.f32.mxu0 %vm4028_vm0, %v4029_v1  ;;  %3554 = vmatprep.mubr.msk.f32.mxu1 %vm4028_vm0, %v4029_v1 }
 0x17a   : > { %3713 = vmatprep.subr.bf16.mxu0 %v4027_v0  ;;  %3731 = vmatprep.subr.bf16.mxu1 %v4027_v0 }
 0x17f   : > { %3513 = vmatmul.mubr.f32.vlgmr.msra.gmra.mrb[2].mxu0 %v1298_v6  ;;  %3555 = vmatmul.mubr.f32.vlgmr.msra.gmra.mrb[2].mxu1 %v1298_v6 }
 0x180   : > { %3715 = vmatpush3.bf16.msra.mxu0 %v4268_v40  ;;  %3733 = vmatpush3.bf16.msra.mxu1 %v4270_v44 }
 0x181   : > { %3561 = vmatprep.mubr.msk.f32.mxu0 %vm4028_vm0, %v4029_v1  ;;  %3603 = vmatprep.mubr.msk.f32.mxu1 %vm4028_vm0, %v4029_v1 }
 0x182   : > { %3716 = vmatprep.subr.bf16.mxu0 %v4027_v0  ;;  %3734 = vmatprep.subr.bf16.mxu1 %v4027_v0 }
 0x183   : > { %3562 = vmatmul.mubr.f32.vlgmr.msra.gmra.mrb[4].mxu0 %v2225_v17  ;;  %3604 = vmatmul.mubr.f32.vlgmr.msra.gmra.mrb[4].mxu1 %v2225_v17 }
 0x184   : > { %3718 = vmatpush3.bf16.msra.mxu0 %v4276_v58  ;;  %3736 = vmatpush3.bf16.msra.mxu1 %v4278_v59 }
 0x185   : > { %3568 = vmatprep.mubr.msk.f32.mxu0 %vm4028_vm0, %v4029_v1  ;;  %3610 = vmatprep.mubr.msk.f32.mxu1 %vm4028_vm0, %v4029_v1 }
 0x186   : > { %3719 = vmatprep.subr.bf16.mxu0 %v4027_v0  ;;  %3737 = vmatprep.subr.bf16.mxu1 %v4027_v0 }
 0x18b   : > { %3569 = vmatmul.mubr.f32.vlgmr.msra.gmra.mrb[4].mxu0 %v4316_v13  ;;  %3611 = vmatmul.mubr.f32.vlgmr.msra.gmra.mrb[4].mxu1 %v4316_v13 }
 0x18c   : > { %3721 = vmatpush3.bf16.msra.mxu0 %v4280_v60  ;;  %3739 = vmatpush3.bf16.msra.mxu1 %v4282_v61 }
 0x18d   : > { %3575 = vmatprep.mubr.msk.f32.mxu0 %vm4028_vm0, %v4029_v1  ;;  %3617 = vmatprep.mubr.msk.f32.mxu1 %vm4028_vm0, %v4029_v1 }
 0x18e   : > { %3722 = vmatprep.subr.bf16.mxu0 %v4027_v0  ;;  %3740 = vmatprep.subr.bf16.mxu1 %v4027_v0 }
 0x193   : > { %3576 = vmatmul.mubr.f32.vlgmr.msra.gmra.mrb[4].mxu0 %v2222_v14  ;;  %3618 = vmatmul.mubr.f32.vlgmr.msra.gmra.mrb[4].mxu1 %v2222_v14 }
 0x194   : > { %3724 = vmatpush3.bf16.msra.mxu0 %v4268_v40  ;;  %3742 = vmatpush3.bf16.msra.mxu1 %v4270_v44 }
 0x195   : > { %3582 = vmatprep.mubr.msk.f32.mxu0 %vm4028_vm0, %v4029_v1  ;;  %3624 = vmatprep.mubr.msk.f32.mxu1 %vm4028_vm0, %v4029_v1 }
 0x196   : > { %3725 = vmatprep.subr.bf16.mxu0 %v4027_v0  ;;  %3743 = vmatprep.subr.bf16.mxu1 %v4027_v0 }
 0x19b   : > { %3583 = vmatmul.mubr.f32.vlgmr.msra.gmra.mrb[4].mxu0 %v2223_v15  ;;  %3625 = vmatmul.mubr.f32.vlgmr.msra.gmra.mrb[4].mxu1 %v2223_v15 }
 0x19c   : > { %3727 = vmatpush3.bf16.msra.mxu0 %v4284_v62  ;;  %3745 = vmatpush3.bf16.msra.mxu1 %v4286_v63 }
 0x19d   : > { %3589 = vmatprep.mubr.msk.f32.mxu0 %vm4028_vm0, %v4029_v1  ;;  %3631 = vmatprep.mubr.msk.f32.mxu1 %vm4028_vm0, %v4029_v1 }
 0x19e   : > { %3728 = vmatprep.subr.bf16.mxu0 %v4027_v0  ;;  %3746 = vmatprep.subr.bf16.mxu1 %v4027_v0 }
 0x1a3   : > { %3590 = vmatmul.mubr.f32.vlgmr.msra.gmra.mrb[4].mxu0 %v4316_v13  ;;  %3632 = vmatmul.mubr.f32.vlgmr.msra.gmra.mrb[4].mxu1 %v4316_v13 }
 0x1a4   : > { %3730 = vmatpush3.bf16.msra.mxu0 %v4268_v40  ;;  %3748 = vmatpush3.bf16.msra.mxu1 %v4270_v44 }
 0x1a5   : > { %3596 = vmatprep.mubr.msk.f32.mxu0 %vm4028_vm0, %v4029_v1  ;;  %3638 = vmatprep.mubr.msk.f32.mxu1 %vm4028_vm0, %v4029_v1 }
 0x1ab   : > { %3597 = vmatmul.mubr.f32.vlgmr.msra.gmra.mrb[4].mxu0 %v4316_v13  ;;  %3639 = vmatmul.mubr.f32.vlgmr.msra.gmra.mrb[4].mxu1 %v4316_v13 }
 0x252   : > { %v1686_v0 = vpop.f32.mrb[2].mxu0  ;;  %v2147_v1 = vpop.f32.mrb[2].mxu1 }
 0x253   : > { %3073 = vst.msk [vmem:[%s290_s9] sm:$0xff] %vm3072_vm2, %v1686_v0  ;;  %3074 = vst.msk [vmem:[%s4397_s14] sm:$0xff] %vm3072_vm2, %v2147_v1  ;;  %v3514_v18 = vpop.f32.mrb[3].mxu0  ;;  %v3556_v19 = vpop.f32.mrb[3].mxu1 }
 0x254   : > { %3937 = shalt.err (!%p3934_p3)
}
 0x255   : > { %s3938_s11 = scalar_lea.hbm %s4392_s10, 128  ;;  %s3942_s12 = scalar_lea.hbm %s4470_s5, 1024 }
 0x256   : > { %p3939_p5 = scmp.ne.s32.totalorder %s4392_s10, %s3938_s11  ;;  %p3943_p2 = scmp.lt.u32.totalorder %s4392_s10, %s4470_s5 }
 0x257   : > { %p3944_p4 = scmp.lt.u32.totalorder %s3942_s12, %s3938_s11  ;;  %p3946_p8 = scmp.lt.u32.totalorder %s3938_s11, %s4392_s10 }
 0x258   : > { %p3940_p6 = pnand %p3939_p5, %p4485_p9 }
 0x259   : > { %p3945_p10 = por %p3944_p4, %p3943_p2 }
 0x25a   : > { %p3941_p7 = pneg %p3940_p6 }
 0x25b   : > { %p3947_p12 = por %p3946_p8, %p3945_p10 }
 0x25d   : > { %p3948_p0 = pnand %p3947_p12, %p3941_p7 }
 0x25f   : > { %3951 = shalt.err (!%p3948_p0)
}
 0x260   : > { %3813 = dma.vmem_to_hbm [thread:$0]  (%p4485_p9), %s4394_s7, 128, %s4392_s10, %s3080_s15   ;;  %v3141_v24 = vld [vmem:[%s4397_s14] sm:$0xff] (%p4485_p9) }
 0x261   : > { %s3810_s29 = smul.u32 (%p4485_p9), 12, %s4010_s25  ;;  %s4486_s19 = sld [smem:[#allocation12_spill]] (%p4485_p9) }
 0x263   : > { %s3107_s6 = sadd.s32 (%p4485_p9), %s4006_s24, %s3810_s29 }
 0x264   : > { %s3278_s7 = sshll.u32 (%p4485_p9), %s3107_s6, 3 }
 0x267   : > { %s3109_s8 = scalar_lea.vmem (%p4485_p9), %s4486_s19, %s3278_s7 }
 0x268   : > { %3142 = vst [vmem:[%s3109_s8] sm:$0xff] (%p4485_p9), %v3141_v24 }
 0x279   : > { %3105 = sbr.rel (!%p4485_p9) target bundleno = 648 (0x288), region = 52 }
 0x27e   : > { %v2609_v20 = vpop.f32.mrb[4].mxu0  ;;  %v3068_v21 = vpop.f32.mrb[4].mxu1 }
 0x27f   : > { %3273 = vst.msk [vmem:[%s4397_s14 + $0x8] sm:$0xff] %vm3072_vm2, %v2609_v20  ;;  %3274 = vst.msk [vmem:[%s4397_s14 + $0x10] sm:$0xff] %vm3072_vm2, %v3068_v21  ;;  %v3598_v22 = vpop.f32.mrb[5].mxu0  ;;  %v3640_v23 = vpop.f32.mrb[5].mxu1 }
 0x286   : > { %v3143_v25 = vld [vmem:[%s4397_s14 + $0x8] sm:$0xff]  ;;  %v3145_v26 = vld [vmem:[%s4397_s14 + $0x10] sm:$0xff] }
 0x287   : > { %3144 = vst [vmem:[%s3109_s8 + $0x20] sm:$0xff] %v3143_v25  ;;  %3146 = vst [vmem:[%s3109_s8 + $0x40] sm:$0xff] %v3145_v26 }
 0x288 PF: > { %s4487_s13 = sld [smem:[#allocation9_spill]]  ;;  %p3824_p9 = scmp.ge.s32.totalorder %s4022_s28, 2 }
 0x289   : > { %p4488_p11 = scmp.ne.s32.totalorder %s4483_s16, 0 }
 0x28b   : > { %p3820_p13 = pnand %p3824_p9, %p4488_p11 }
 0x28e   : > { %s3158_s20 = sand.u32 1, %s4487_s13  }
 0x28f   : > { %s3159_s24 = scalar_lea.sflag [#allocation4], %s3158_s20 }
 0x290   : > { %3989 = dma.done.wait (!%p3820_p13), %s3159_s24, 128  }
 0x291   : > { %3991 = vsyncadd (!%p3820_p13), %s3159_s24, 4294967168  ;;  %s23_s28 = sadd.s32 1, %s4022_s28   ;;  %s4489_s14 = sld [smem:[#allocation10_spill]] }
 0x292   : > { %p20_p1 = scmp.ge.s32.totalorder %s23_s28, 10   ;;  %s4490_s11 = sld [smem:[#allocation11_spill]] }
 0x293   : > { %s4491_s21 = smov %s3998_s22  ;;  %s4492_s22 = smov %s4002_s23 }
 0x294   : > { %s4493_s23 = smov %s4144_s18  ;;  %s4494_s24 = smov %s4014_s26 }
 0x295   : > { %s4495_s25 = smov %s4018_s27  ;;  %22 = sbr.rel (!%p20_p1) target bundleno = 9 (0x9), region = 137 }
 0x297   : > { %s4496_s26 = smov %s4489_s14 }
 0x298   : > { %s4497_s27 = smov %s4490_s11 }
 0x29c   :  { %3171 = vsyncpa [#allocation3], 1 }
 0x29d   :  { %3173 = vsyncpa [#allocation3 + $0x1], 1 }
 0x29e   :  { %3174 = vsyncpa [#allocation4], 1 }
 0x29f   :  { %3176 = vsyncpa [#allocation4 + $0x1], 1 }

</bundles_post_ra>
